<compile_context>
chip_gen: v7x
topology: tpu7x:2x2x1
jax: 0.10.0
libtpu: 0.0.40
codegen_flags: <defaults>
</compile_context>

<pallas_src>
import functools

import jax
import jax.numpy as jnp
from jax.experimental import pallas as pl
from jax.experimental.pallas import tpu as pltpu


def _round_up(x, m):
    return ((x + m - 1) // m) * m


def roberta_output_kernel(x_ref, w_ref, b_ref, o_ref, *, compute_dtype):
    # x_ref: (TM, I)  w_ref: (I, H) [compute dtype]  b_ref: (1, H) f32  o_ref: (TM, H)
    x = x_ref[...]
    if compute_dtype is not None and x.dtype != compute_dtype:
        # In-kernel VPU cast: avoids a standalone M x I astype pass over HBM.
        x = x.astype(compute_dtype)
    acc = jnp.dot(x, w_ref[...], preferred_element_type=jnp.float32)
    o_ref[...] = (acc + b_ref[...]).astype(o_ref.dtype)


def _vmem_ceiling_bytes():
    """~80% of this generation's VMEM (headroom for Mosaic internal scratch)."""
    try:
        cap = pltpu.get_tpu_info().vmem_capacity_bytes
    except Exception:
        cap = 64 << 20  # conservative fallback: v7x per-TensorCore VMEM
    return int(cap * 0.8)


def roberta_output(hidden_states, weight, bias, *, tile_m=1024,
                   compute_dtype=jnp.bfloat16):
    """hidden_states: (B, S, I); weight: (I, H) (== torch weight.T); bias: (H,)."""
    B, S, I = hidden_states.shape
    I_w, H = weight.shape
    assert I == I_w, (I, I_w)
    M = B * S
    out_dtype = hidden_states.dtype

    # Activation stays in its stored dtype (cast happens inside the kernel);
    # the small weight parameter is cast once here (in a real model it would
    # already be stored in bf16).
    x2d = hidden_states.reshape(M, I)
    if compute_dtype is not None and weight.dtype != compute_dtype:
        weight = weight.astype(compute_dtype)
    b2d = bias.astype(jnp.float32).reshape(1, H)

    x_sz = jnp.dtype(x2d.dtype).itemsize
    w_sz = jnp.dtype(weight.dtype).itemsize
    o_sz = jnp.dtype(out_dtype).itemsize

    def _budget(tm, w_bufs):
        # double-buffered activation/output tiles + resident weight/bias.
        return (2 * tm * I * x_sz + 2 * tm * H * o_sz
                + w_bufs * I * H * w_sz + w_bufs * H * 4)

    # --- tile sizing ---------------------------------------------------------
    tile_m = max(8, _round_up(tile_m, 8))

    # Shrink the tile if the (single-buffered-weight) budget would not fit in
    # this generation's VMEM (e.g. f32 weights + large tiles on v7x's 64 MiB).
    ceiling = _vmem_ceiling_bytes()
    while _budget(tile_m, 1) * 5 // 4 + (2 << 20) > ceiling and tile_m > 64:
        tile_m = max(64, _round_up(tile_m // 2, 8))

    if M <= tile_m:
        if M > 8:
            # Ensure >= 2 grid steps so both v7x TensorCores get work
            # (no-op cost on single-TC v5e/v6e).
            tile_m = _round_up(pl.cdiv(M, 2), 8)
        else:
            # Single tiny block; block dim == full array dim satisfies layout rules.
            tile_m = M
    grid_m = pl.cdiv(M, tile_m)  # ragged tail handled by Pallas masking (no pad)

    cost = pl.CostEstimate(
        flops=2 * M * I * H,
        transcendentals=0,
        bytes_accessed=M * I * x_sz + I * H * w_sz + M * H * o_sz + H * 4,
    )

    kernel = functools.partial(roberta_output_kernel, compute_dtype=compute_dtype)

    def run(single_buffer_weight):
        w_bufs = 1 if single_buffer_weight else 2
        vmem_bytes = int(min(max(_budget(tile_m, w_bufs) * 5 // 4 + (2 << 20),
                                 32 << 20), ceiling))
        if single_buffer_weight:
            # Grid-invariant operands: one VMEM buffer is enough.
            w_spec = pl.BlockSpec((I, H), lambda i: (0, 0),
                                  pipeline_mode=pl.Buffered(1))
            b_spec = pl.BlockSpec((1, H), lambda i: (0, 0),
                                  pipeline_mode=pl.Buffered(1))
        else:
            w_spec = pl.BlockSpec((I, H), lambda i: (0, 0))
            b_spec = pl.BlockSpec((1, H), lambda i: (0, 0))

        return pl.pallas_call(
            kernel,
            out_shape=jax.ShapeDtypeStruct((M, H), out_dtype),
            grid_spec=pltpu.PrefetchScalarGridSpec(
                num_scalar_prefetch=0,
                grid=(grid_m,),
                in_specs=[
                    pl.BlockSpec((tile_m, I), lambda i: (i, 0)),  # activation tile
                    w_spec,                                       # full weight (VMEM-resident)
                    b_spec,                                       # bias row (f32)
                ],
                out_specs=pl.BlockSpec((tile_m, H), lambda i: (i, 0)),
            ),
            compiler_params=pltpu.CompilerParams(
                dimension_semantics=("parallel",),
                vmem_limit_bytes=vmem_bytes),
            cost_estimate=cost,
        )(x2d, weight, b2d)

    try:
        out2d = run(True)
    except Exception:
        # pipeline_mode=pl.Buffered(1) not supported by this jax/Mosaic build:
        # fall back to default double buffering (correctness unchanged).
        out2d = run(False)

    return out2d.reshape(B, S, H)


def reference(hidden_states, weight, bias):
    return jnp.einsum("bsi,ih->bsh", hidden_states, weight) + bias


if __name__ == "__main__":
    # Small config consistent with the module:
    #   intermediate_size = 64, hidden_size = 32, batch = 2, seq = 8
    batch, seq = 2, 8
    intermediate_size, hidden_size = 64, 32

    key = jax.random.PRNGKey(0)
    k_x, k_w, k_b = jax.random.split(key, 3)

    hidden_states = jax.random.normal(
        k_x, (batch, seq, intermediate_size), dtype=jnp.float32)
    # nn.Linear parameters (weight stored as (in, out) == torch weight.T)
    weight = jax.random.normal(
        k_w, (intermediate_size, hidden_size), dtype=jnp.float32) * 0.02
    bias = jax.random.normal(k_b, (hidden_size,), dtype=jnp.float32) * 0.02

    ref = reference(hidden_states, weight, bias)

    # 1) Default path: bf16 MXU inputs, f32 accumulation.
    out = jax.block_until_ready(roberta_output(hidden_states, weight, bias))
    assert out.shape == (batch, seq, hidden_size)
    assert jnp.allclose(out, ref, atol=2e-2, rtol=2e-2)

    # 2) Exact f32 compute path.
    out_f32 = jax.block_until_ready(
        roberta_output(hidden_states, weight, bias, compute_dtype=None))
    assert jnp.allclose(out_f32, ref, atol=1e-5, rtol=1e-5)

    # 3) Non-divisible token count (M = 15): exercises the pad-free cdiv grid
    #    with a ragged tail block.
    hs_odd = jax.random.normal(k_x, (3, 5, intermediate_size), dtype=jnp.float32)
    out_odd = jax.block_until_ready(
        roberta_output(hs_odd, weight, bias, compute_dtype=None))
    assert out_odd.shape == (3, 5, hidden_size)
    assert jnp.allclose(out_odd, reference(hs_odd, weight, bias),
                        atol=1e-5, rtol=1e-5)

    print("KERNEL_OK")
</pallas_src>

<mosaic_0001>
module attributes {stable_mosaic.version = 11 : i64} {
  func.func @roberta_output_kernel(%arg0: i32, %arg1: memref<8x64xf32, #tpu.memory_space<vmem>>, %arg2: memref<64x32xbf16, #tpu.memory_space<vmem>>, %arg3: memref<1x32xf32, #tpu.memory_space<vmem>>, %arg4: memref<8x32xf32, #tpu.memory_space<vmem>>) attributes {dimension_semantics = [#tpu.dimension_semantics<parallel>], iteration_bounds = array<i64: 2>, scalar_prefetch = 0 : i64, scratch_operands = 0 : i64, tpu.core_type = #tpu.core_type<tc>, window_params = [{transform_indices = @transform_0, window_bounds = array<i64: 8, 64>}, {pipeline_mode = #tpu.pipeline_mode<synchronous>, transform_indices = @transform_1, window_bounds = array<i64: 64, 32>}, {pipeline_mode = #tpu.pipeline_mode<synchronous>, transform_indices = @transform_2, window_bounds = array<i64: 1, 32>}, {transform_indices = @transform_3, window_bounds = array<i64: 8, 32>}]} {
    %c0 = arith.constant 0 : index
    %c0_0 = arith.constant 0 : index
    %0 = vector.load %arg1[%c0, %c0_0] : memref<8x64xf32, #tpu.memory_space<vmem>>, vector<8x64xf32>
    %1 = arith.truncf %0 : vector<8x64xf32> to vector<8x64xbf16>
    %c0_1 = arith.constant 0 : index
    %c0_2 = arith.constant 0 : index
    %2 = vector.load %arg2[%c0_1, %c0_2] : memref<64x32xbf16, #tpu.memory_space<vmem>>, vector<64x32xbf16>
    %cst = arith.constant dense<0.000000e+00> : vector<8x32xf32>
    %3 = tpu.matmul %1, %2, %cst {dimension_numbers = #tpu.dot_dimension_numbers<[1], [0], [0], [1], [0, 0, 1, 1], [], []>} : vector<8x64xbf16>, vector<64x32xbf16>, vector<8x32xf32> -> vector<8x32xf32>
    %c0_3 = arith.constant 0 : index
    %c0_4 = arith.constant 0 : index
    %4 = vector.load %arg3[%c0_3, %c0_4] : memref<1x32xf32, #tpu.memory_space<vmem>>, vector<1x32xf32>
    %5 = vector.broadcast %4 : vector<1x32xf32> to vector<8x32xf32>
    %6 = arith.addf %3, %5 : vector<8x32xf32>
    %c0_5 = arith.constant 0 : index
    %c0_6 = arith.constant 0 : index
    %7 = vector.load %arg4[%c0_5, %c0_6] : memref<8x32xf32, #tpu.memory_space<vmem>>, vector<8x32xf32>
    tpu.vector_store %arg4[%c0_5, %c0_6], %6 {strides = array<i32>} : memref<8x32xf32, #tpu.memory_space<vmem>>, vector<8x32xf32>,
    return
  }
  func.func @transform_0(%arg0: i32) -> (i32, i32) {
    %c0_i32 = arith.constant 0 : i32
    %c0_i32_0 = arith.constant 0 : i32
    return %arg0, %c0_i32 : i32, i32
  }
  func.func @transform_1(%arg0: i32) -> (i32, i32) {
    %c0_i32 = arith.constant 0 : i32
    %c0_i32_0 = arith.constant 0 : i32
    %c0_i32_1 = arith.constant 0 : i32
    return %c0_i32, %c0_i32_0 : i32, i32
  }
  func.func @transform_2(%arg0: i32) -> (i32, i32) {
    %c0_i32 = arith.constant 0 : i32
    %c0_i32_0 = arith.constant 0 : i32
    %c0_i32_1 = arith.constant 0 : i32
    return %c0_i32, %c0_i32_0 : i32, i32
  }
  func.func @transform_3(%arg0: i32) -> (i32, i32) {
    %c0_i32 = arith.constant 0 : i32
    %c0_i32_0 = arith.constant 0 : i32
    return %arg0, %c0_i32 : i32, i32
  }
}

module attributes {stable_mosaic.version = 11 : i64} {
  func.func @roberta_output_kernel(%arg0: i32, %arg1: memref<8x64xf32, #tpu.memory_space<vmem>>, %arg2: memref<64x32xbf16, #tpu.memory_space<vmem>>, %arg3: memref<1x32xf32, #tpu.memory_space<vmem>>, %arg4: memref<8x32xf32, #tpu.memory_space<vmem>>) attributes {dimension_semantics = [#tpu.dimension_semantics<parallel>], iteration_bounds = array<i64: 2>, scalar_prefetch = 0 : i64, scratch_operands = 0 : i64, tpu.core_type = #tpu.core_type<tc>, window_params = [{transform_indices = @transform_0, window_bounds = array<i64: 8, 64>}, {pipeline_mode = #tpu.pipeline_mode<synchronous>, transform_indices = @transform_1, window_bounds = array<i64: 64, 32>}, {pipeline_mode = #tpu.pipeline_mode<synchronous>, transform_indices = @transform_2, window_bounds = array<i64: 1, 32>}, {transform_indices = @transform_3, window_bounds = array<i64: 8, 32>}]} {
    %c0 = arith.constant 0 : index
    %c0_0 = arith.constant 0 : index
    %0 = vector.load %arg1[%c0, %c0_0] : memref<8x64xf32, #tpu.memory_space<vmem>>, vector<8x64xf32>
    %1 = arith.truncf %0 : vector<8x64xf32> to vector<8x64xbf16>
    %c0_1 = arith.constant 0 : index
    %c0_2 = arith.constant 0 : index
    %2 = vector.load %arg2[%c0_1, %c0_2] : memref<64x32xbf16, #tpu.memory_space<vmem>>, vector<64x32xbf16>
    %cst = arith.constant dense<0.000000e+00> : vector<8x32xf32>
    %3 = tpu.matmul %1, %2, %cst {dimension_numbers = #tpu.dot_dimension_numbers<[1], [0], [0], [1], [0, 0, 1, 1], [], []>} : vector<8x64xbf16>, vector<64x32xbf16>, vector<8x32xf32> -> vector<8x32xf32>
    %c0_3 = arith.constant 0 : index
    %c0_4 = arith.constant 0 : index
    %4 = vector.load %arg3[%c0_3, %c0_4] : memref<1x32xf32, #tpu.memory_space<vmem>>, vector<1x32xf32>
    %5 = vector.broadcast %4 : vector<1x32xf32> to vector<8x32xf32>
    %6 = arith.addf %3, %5 : vector<8x32xf32>
    %c0_5 = arith.constant 0 : index
    %c0_6 = arith.constant 0 : index
    %7 = vector.load %arg4[%c0_5, %c0_6] : memref<8x32xf32, #tpu.memory_space<vmem>>, vector<8x32xf32>
    tpu.vector_store %arg4[%c0_5, %c0_6], %6 {strides = array<i32>} : memref<8x32xf32, #tpu.memory_space<vmem>>, vector<8x32xf32>,
    return
  }
  func.func @transform_0(%arg0: i32) -> (i32, i32) {
    %c0_i32 = arith.constant 0 : i32
    %c0_i32_0 = arith.constant 0 : i32
    return %arg0, %c0_i32 : i32, i32
  }
  func.func @transform_1(%arg0: i32) -> (i32, i32) {
    %c0_i32 = arith.constant 0 : i32
    %c0_i32_0 = arith.constant 0 : i32
    %c0_i32_1 = arith.constant 0 : i32
    return %c0_i32, %c0_i32_0 : i32, i32
  }
  func.func @transform_2(%arg0: i32) -> (i32, i32) {
    %c0_i32 = arith.constant 0 : i32
    %c0_i32_0 = arith.constant 0 : i32
    %c0_i32_1 = arith.constant 0 : i32
    return %c0_i32, %c0_i32_0 : i32, i32
  }
  func.func @transform_3(%arg0: i32) -> (i32, i32) {
    %c0_i32 = arith.constant 0 : i32
    %c0_i32_0 = arith.constant 0 : i32
    return %arg0, %c0_i32 : i32, i32
  }
}

</mosaic_0001>

<bundles_post_ra>
// kernel: tpu_custom_call.1
= control target key start
LH: loop header
LB: loop body
LE: loop exit
PB: predicated region body
PF: predicated region fallthrough
CT: control target
= control target key end

     0   :  { %8 = vsyncpa [#allocation3], 0  ;;  %s607_s0 = inlined_call_operand.vmem [shape: f32[16,64], index: 0, kind: input, shape index: {}]   ;;  %s608_s1 = inlined_call_operand.vmem [shape: bf16[64,32], index: 1, kind: input, shape index: {}]   ;;  %s609_s2 = inlined_call_operand.vmem [shape: f32[1,32], index: 2, kind: input, shape index: {}]   ;;  %s610_s3 = inlined_call_operand.hbm [shape: f32[16,32], index: 3, kind: output, shape index: {}]  }
   0x1   :  { %10 = vsyncpa [#allocation3 + $0x1], 0  ;;  %s492_s12 = smov 0   ;;  %s494_s13 = smov 0  }
   0x2   :  { %s496_s14 = smov 0   ;;  %s498_s15 = smov 0  }
   0x3 LB: > { %s513_s16 = sadd.s32 4294967295, %s467_s15   ;;  %s327_s17 = sadd.s32 4294967294, %s467_s15   ;;  %s467_s15 = sphi %s498_s15, %s616_s15   ;;  %s463_s14 = sphi %s496_s14, %s615_s14   ;;  %s459_s13 = sphi %s494_s13, %s614_s13   ;;  %s455_s12 = sphi %s492_s12, %s613_s12  }
   0x4   : > { %s517_s18 = sadd.s32 1, %s467_s15   ;;  %s91_s19 = sadd.s32 1, %s463_s14 }
   0x5   : > { %s88_s20 = ssub.s32 %s467_s15, %s517_s18  ;;  %p101_p0 = scmp.ne.s32.totalorder %s463_s14, %s459_s13 }
   0x6   : > { %p89_p1 = scmp.eq.s32.totalorder %s88_s20, 0  ;;  %p102_p2 = scmp.eq.s32.totalorder %s513_s16, 1 }
   0x7   : > { %p107_p3 = scmp.ne.s32.totalorder %s459_s13, %s455_s12  ;;  %p108_p4 = scmp.eq.s32.totalorder %s327_s17, 1 }
   0x8   : > { %s528_s21 = scalar_select %p89_p1, %s463_s14, %s91_s19  }
   0x9   : > { %p530_p5 = por %p102_p2, %p101_p0  ;;  %p534_p6 = por %p108_p4, %p107_p3 }
   0xa   : > { %p330_p7 = scmp.ge.s32.totalorder %s467_s15, 1  ;;  %p139_p8 = scmp.lt.s32.totalorder %s467_s15, 3 }
   0xc   : > { %p140_p9 = pnand %p330_p7, %p139_p8 }
   0xd   : > { %v401_v0 = vld [vmem:[%s608_s1] sm:$0xff] (!%p140_p9)   ;;  %v469_v1 = vmov (!%p140_p9), 0.0   ;;  %v402_v2 = vld [vmem:[%s608_s1 + $0x8] sm:$0xff] (!%p140_p9)   ;;  %vm470_vm0 = vmmov (!%p140_p9), 0   ;;  %p162_p10 = scmp.lt.s32.totalorder (!%p140_p9), %s513_s16, 1  ;;  %v403_v3 = vld [vmem:[%s608_s1 + $0x10] sm:$0xff] (!%p140_p9)  }
   0xe   : > { %143 = sbr.rel (%p140_p9) target bundleno = 258 (0x102), region = 32  ;;  %348 = vmatprep.subr.bf16.mxu0 (!%p140_p9), %v469_v1  ;;  %356 = vmatprep.mubr.msk.bf16.mxu0 (!%p140_p9), %vm470_vm0, %v469_v1  ;;  %v404_v4 = vld [vmem:[%s608_s1 + $0x18] sm:$0xff] (!%p140_p9)   ;;  %vm208_vm1 = vcmask (!%p140_p9), 523264   ;;  %s159_s10 = sand.u32 (!%p140_p9), 1, %s459_s13   ;;  %v333_v7 = vld [vmem:[%s609_s2] ss:$0 sm:$0xff] (!%p140_p9) }
   0xf   : > { %349 = vmatpush3.bf16.msra.mxu0 (!%p140_p9), %v401_v0  ;;  %s331_s11 = sshll.u32 (!%p140_p9), %s159_s10, 3  ;;  %s340_s20 = sshll.u32 (!%p140_p9), %s513_s16, 7  ;;  %vm252_vm2 = vcmask (!%p140_p9), 261120  }
  0x10   : > { %350 = vmatprep.subr.bf16.mxu0 (!%p140_p9), %v469_v1  ;;  %s161_s24 = scalar_lea.vmem (!%p140_p9), [#allocation2], %s331_s11  ;;  %s471_s30 = smov (!%p140_p9), [#allocation2]  }
  0x11   : > { %s268_s25 = sshll.u32 (!%p140_p9), %s161_s24, 4  ;;  %s567_s25 = int_to_ptr.vmem [resolvable:$true] %s268_s25 }
  0x12   : > { %s405_s29 = scalar_lea.vmem (!%p140_p9), %s567_s25, 128 }
  0x13   : > { %351 = vmatpush3.bf16.msra.mxu0 (!%p140_p9), %v402_v2  ;;  %p406_p11 = scmp.ne.s32.totalorder (!%p140_p9), %s567_s25, %s405_s29 }
  0x14   : > { %352 = vmatprep.subr.bf16.mxu0 (!%p140_p9), %v469_v1 }
  0x15   : > { %s163_s28 = scalar_select %p162_p10, %s513_s16, 1 }
  0x16   : > { %s255_s16 = scalar_lea.sflag [#allocation3], %s159_s10  ;;  %p407_p12 = pnand %p406_p11, %p530_p5 }
  0x17   : > { %s332_s4 = sshll.u32 %s163_s28, 3  ;;  %353 = vmatpush3.bf16.msra.mxu0 %v403_v3  ;;  %s565_s28 = scalar_lea.hbm %s610_s3, %s340_s20 }
  0x18   : > { %s165_s7 = scalar_lea.vmem %s607_s0, %s332_s4  ;;  %354 = vmatprep.subr.bf16.mxu0 %v469_v1  ;;  %p408_p13 = pneg %p407_p12 }
  0x19   : > { %v167_v5 = vld [vmem:[%s165_s7] sm:$0xff]  ;;  %s409_s4 = sshll.u32 %s471_s30, 4  ;;  %s410_s4 = int_to_ptr.vmem [resolvable:$false] %s409_s4 }
  0x1a   : > { %v168_v6 = vpack.c.bf16 %v167_v5, %v167_v5  ;;  %s411_s5 = scalar_lea.vmem %s410_s4, 256  ;;  %p412_p0 = scmp.lt.s32.totalorder %s567_s25, %s410_s4 }
  0x1b   : > { %355 = vmatpush3.bf16.msra.mxu0 %v404_v4  ;;  %p413_p1 = scmp.lt.s32.totalorder %s411_s5, %s405_s29 }
  0x1d   : > { %p414_p2 = por %p413_p1, %p412_p0 }
  0x1e   : > { %357 = vmatmul.mubr.msk.bf16.vlgmr.msra.gmra.mrb[0].mxu0 %vm208_vm1, %v168_v6 }
  0x1f   : > { %p415_p3 = pnand %p414_p2, %p408_p13 }
  0xf1   : > { %v246_v8 = vpop.f32.mrb[0].mxu0 }
  0xf2   : > { %v247_v9 = vadd.f32 %v333_v7, %v246_v8  ;;  %v358_v10 = vpop.f32.mrb[1].mxu0 }
  0xf3   : > { %v249_v11 = vpop.f32.mrb[2].mxu0 }
  0xf4   : > { %v359_v12 = vpop.f32.mrb[3].mxu0  ;;  %253 = vst.msk [vmem:[%s161_s24] sm:$0xff] %vm252_vm2, %v247_v9 }
  0xf5   : > { %418 = shalt.err (!%p415_p3)
}
  0xf6   : > { %s419_s6 = scalar_lea.hbm %s565_s28, 128  ;;  %s423_s9 = scalar_lea.hbm %s610_s3, 256 }
  0xf7   : > { %p420_p4 = scmp.ne.s32.totalorder %s565_s28, %s419_s6  ;;  %p424_p9 = scmp.lt.u32.totalorder %s565_s28, %s610_s3 }
  0xf8   : > { %p425_p10 = scmp.lt.u32.totalorder %s423_s9, %s419_s6  ;;  %p427_p12 = scmp.lt.u32.totalorder %s419_s6, %s565_s28 }
  0xf9   : > { %p421_p7 = pnand %p420_p4, %p530_p5 }
  0xfa   : > { %p426_p11 = por %p425_p10, %p424_p9 }
  0xfb   : > { %p422_p8 = pneg %p421_p7 }
  0xfc   : > { %p428_p13 = por %p427_p12, %p426_p11 }
  0xfe   : > { %p429_p0 = pnand %p428_p13, %p422_p8 }
 0x100   : > { %432 = shalt.err (!%p429_p0)
}
 0x101   : > { %360 = dma.vmem_to_hbm [thread:$0]  (%p530_p5), %s567_s25, 128, %s565_s28, %s255_s16  }
 0x102 PF: > { %p366_p1 = scmp.ge.s32.totalorder %s467_s15, 2  ;;  %s280_s17 = sand.u32 1, %s455_s12  }
 0x103   : > { %s281_s19 = scalar_lea.sflag [#allocation3], %s280_s17 }
 0x104   : > { %p363_p2 = pnand %p366_p1, %p534_p6 }
 0x106   : > { %450 = dma.done.wait (!%p363_p2), %s281_s19, 128  }
 0x107   : > { %452 = vsyncadd (!%p363_p2), %s281_s19, 4294967168  ;;  %p13_p3 = scmp.ge.s32.totalorder %s517_s18, 4   ;;  %s613_s12 = smov %s459_s13 }
 0x108   : > { %s614_s13 = smov %s463_s14  ;;  %s615_s14 = smov %s528_s21 }
 0x109   : > { %s616_s15 = smov %s517_s18  ;;  %15 = sbr.rel (!%p13_p3) target bundleno = 3 (0x3), region = 67 }
 0x110   :  { %286 = vsyncpa [#allocation3], 1 }
 0x111   :  { %288 = vsyncpa [#allocation3 + $0x1], 1 }

// kernel: tpu_custom_call.1
= control target key start
LH: loop header
LB: loop body
LE: loop exit
PB: predicated region body
PF: predicated region fallthrough
CT: control target
= control target key end

     0   :  { %8 = vsyncpa [#allocation3], 0  ;;  %s607_s0 = inlined_call_operand.vmem [shape: f32[16,64], index: 0, kind: input, shape index: {}]   ;;  %s608_s1 = inlined_call_operand.vmem [shape: bf16[64,32], index: 1, kind: input, shape index: {}]   ;;  %s609_s2 = inlined_call_operand.vmem [shape: f32[1,32], index: 2, kind: input, shape index: {}]   ;;  %s610_s3 = inlined_call_operand.hbm [shape: f32[16,32], index: 3, kind: output, shape index: {}]  }
   0x1   :  { %10 = vsyncpa [#allocation3 + $0x1], 0  ;;  %s492_s12 = smov 0   ;;  %s494_s13 = smov 0  }
   0x2   :  { %s496_s14 = smov 0   ;;  %s498_s15 = smov 0  }
   0x3 LB: > { %s513_s16 = sadd.s32 4294967295, %s467_s15   ;;  %s327_s17 = sadd.s32 4294967294, %s467_s15   ;;  %s467_s15 = sphi %s498_s15, %s616_s15   ;;  %s463_s14 = sphi %s496_s14, %s615_s14   ;;  %s459_s13 = sphi %s494_s13, %s614_s13   ;;  %s455_s12 = sphi %s492_s12, %s613_s12  }
   0x4   : > { %s517_s18 = sadd.s32 1, %s467_s15   ;;  %s91_s19 = sadd.s32 1, %s463_s14 }
   0x5   : > { %s88_s20 = ssub.s32 %s467_s15, %s517_s18  ;;  %p101_p0 = scmp.ne.s32.totalorder %s463_s14, %s459_s13 }
   0x6   : > { %p89_p1 = scmp.eq.s32.totalorder %s88_s20, 0  ;;  %p102_p2 = scmp.eq.s32.totalorder %s513_s16, 1 }
   0x7   : > { %p107_p3 = scmp.ne.s32.totalorder %s459_s13, %s455_s12  ;;  %p108_p4 = scmp.eq.s32.totalorder %s327_s17, 1 }
   0x8   : > { %s528_s21 = scalar_select %p89_p1, %s463_s14, %s91_s19  }
   0x9   : > { %p530_p5 = por %p102_p2, %p101_p0  ;;  %p534_p6 = por %p108_p4, %p107_p3 }
   0xa   : > { %p330_p7 = scmp.ge.s32.totalorder %s467_s15, 1  ;;  %p139_p8 = scmp.lt.s32.totalorder %s467_s15, 3 }
   0xc   : > { %p140_p9 = pnand %p330_p7, %p139_p8 }
   0xd   : > { %v401_v0 = vld [vmem:[%s608_s1] sm:$0xff] (!%p140_p9)   ;;  %v469_v1 = vmov (!%p140_p9), 0.0   ;;  %v402_v2 = vld [vmem:[%s608_s1 + $0x8] sm:$0xff] (!%p140_p9)   ;;  %vm470_vm0 = vmmov (!%p140_p9), 0   ;;  %p162_p10 = scmp.lt.s32.totalorder (!%p140_p9), %s513_s16, 1  ;;  %v403_v3 = vld [vmem:[%s608_s1 + $0x10] sm:$0xff] (!%p140_p9)  }
   0xe   : > { %143 = sbr.rel (%p140_p9) target bundleno = 258 (0x102), region = 32  ;;  %348 = vmatprep.subr.bf16.mxu0 (!%p140_p9), %v469_v1  ;;  %356 = vmatprep.mubr.msk.bf16.mxu0 (!%p140_p9), %vm470_vm0, %v469_v1  ;;  %v404_v4 = vld [vmem:[%s608_s1 + $0x18] sm:$0xff] (!%p140_p9)   ;;  %vm208_vm1 = vcmask (!%p140_p9), 523264   ;;  %s159_s10 = sand.u32 (!%p140_p9), 1, %s459_s13   ;;  %v333_v7 = vld [vmem:[%s609_s2] ss:$0 sm:$0xff] (!%p140_p9) }
   0xf   : > { %349 = vmatpush3.bf16.msra.mxu0 (!%p140_p9), %v401_v0  ;;  %s331_s11 = sshll.u32 (!%p140_p9), %s159_s10, 3  ;;  %s340_s20 = sshll.u32 (!%p140_p9), %s513_s16, 7  ;;  %vm252_vm2 = vcmask (!%p140_p9), 261120  }
  0x10   : > { %350 = vmatprep.subr.bf16.mxu0 (!%p140_p9), %v469_v1  ;;  %s161_s24 = scalar_lea.vmem (!%p140_p9), [#allocation2], %s331_s11  ;;  %s471_s30 = smov (!%p140_p9), [#allocation2]  }
  0x11   : > { %s268_s25 = sshll.u32 (!%p140_p9), %s161_s24, 4  ;;  %s567_s25 = int_to_ptr.vmem [resolvable:$true] %s268_s25 }
  0x12   : > { %s405_s29 = scalar_lea.vmem (!%p140_p9), %s567_s25, 128 }
  0x13   : > { %351 = vmatpush3.bf16.msra.mxu0 (!%p140_p9), %v402_v2  ;;  %p406_p11 = scmp.ne.s32.totalorder (!%p140_p9), %s567_s25, %s405_s29 }
  0x14   : > { %352 = vmatprep.subr.bf16.mxu0 (!%p140_p9), %v469_v1 }
  0x15   : > { %s163_s28 = scalar_select %p162_p10, %s513_s16, 1 }
  0x16   : > { %s255_s16 = scalar_lea.sflag [#allocation3], %s159_s10  ;;  %p407_p12 = pnand %p406_p11, %p530_p5 }
  0x17   : > { %s332_s4 = sshll.u32 %s163_s28, 3  ;;  %353 = vmatpush3.bf16.msra.mxu0 %v403_v3  ;;  %s565_s28 = scalar_lea.hbm %s610_s3, %s340_s20 }
  0x18   : > { %s165_s7 = scalar_lea.vmem %s607_s0, %s332_s4  ;;  %354 = vmatprep.subr.bf16.mxu0 %v469_v1  ;;  %p408_p13 = pneg %p407_p12 }
  0x19   : > { %v167_v5 = vld [vmem:[%s165_s7] sm:$0xff]  ;;  %s409_s4 = sshll.u32 %s471_s30, 4  ;;  %s410_s4 = int_to_ptr.vmem [resolvable:$false] %s409_s4 }
  0x1a   : > { %v168_v6 = vpack.c.bf16 %v167_v5, %v167_v5  ;;  %s411_s5 = scalar_lea.vmem %s410_s4, 256  ;;  %p412_p0 = scmp.lt.s32.totalorder %s567_s25, %s410_s4 }
  0x1b   : > { %355 = vmatpush3.bf16.msra.mxu0 %v404_v4  ;;  %p413_p1 = scmp.lt.s32.totalorder %s411_s5, %s405_s29 }
  0x1d   : > { %p414_p2 = por %p413_p1, %p412_p0 }
  0x1e   : > { %357 = vmatmul.mubr.msk.bf16.vlgmr.msra.gmra.mrb[0].mxu0 %vm208_vm1, %v168_v6 }
  0x1f   : > { %p415_p3 = pnand %p414_p2, %p408_p13 }
  0xf1   : > { %v246_v8 = vpop.f32.mrb[0].mxu0 }
  0xf2   : > { %v247_v9 = vadd.f32 %v333_v7, %v246_v8  ;;  %v358_v10 = vpop.f32.mrb[1].mxu0 }
  0xf3   : > { %v249_v11 = vpop.f32.mrb[2].mxu0 }
  0xf4   : > { %v359_v12 = vpop.f32.mrb[3].mxu0  ;;  %253 = vst.msk [vmem:[%s161_s24] sm:$0xff] %vm252_vm2, %v247_v9 }
  0xf5   : > { %418 = shalt.err (!%p415_p3)
}
  0xf6   : > { %s419_s6 = scalar_lea.hbm %s565_s28, 128  ;;  %s423_s9 = scalar_lea.hbm %s610_s3, 256 }
  0xf7   : > { %p420_p4 = scmp.ne.s32.totalorder %s565_s28, %s419_s6  ;;  %p424_p9 = scmp.lt.u32.totalorder %s565_s28, %s610_s3 }
  0xf8   : > { %p425_p10 = scmp.lt.u32.totalorder %s423_s9, %s419_s6  ;;  %p427_p12 = scmp.lt.u32.totalorder %s419_s6, %s565_s28 }
  0xf9   : > { %p421_p7 = pnand %p420_p4, %p530_p5 }
  0xfa   : > { %p426_p11 = por %p425_p10, %p424_p9 }
  0xfb   : > { %p422_p8 = pneg %p421_p7 }
  0xfc   : > { %p428_p13 = por %p427_p12, %p426_p11 }
  0xfe   : > { %p429_p0 = pnand %p428_p13, %p422_p8 }
 0x100   : > { %432 = shalt.err (!%p429_p0)
}
 0x101   : > { %360 = dma.vmem_to_hbm [thread:$0]  (%p530_p5), %s567_s25, 128, %s565_s28, %s255_s16  }
 0x102 PF: > { %p366_p1 = scmp.ge.s32.totalorder %s467_s15, 2  ;;  %s280_s17 = sand.u32 1, %s455_s12  }
 0x103   : > { %s281_s19 = scalar_lea.sflag [#allocation3], %s280_s17 }
 0x104   : > { %p363_p2 = pnand %p366_p1, %p534_p6 }
 0x106   : > { %450 = dma.done.wait (!%p363_p2), %s281_s19, 128  }
 0x107   : > { %452 = vsyncadd (!%p363_p2), %s281_s19, 4294967168  ;;  %p13_p3 = scmp.ge.s32.totalorder %s517_s18, 4   ;;  %s613_s12 = smov %s459_s13 }
 0x108   : > { %s614_s13 = smov %s463_s14  ;;  %s615_s14 = smov %s528_s21 }
 0x109   : > { %s616_s15 = smov %s517_s18  ;;  %15 = sbr.rel (!%p13_p3) target bundleno = 3 (0x3), region = 67 }
 0x110   :  { %286 = vsyncpa [#allocation3], 1 }
 0x111   :  { %288 = vsyncpa [#allocation3 + $0x1], 1 }

</bundles_post_ra>
